<compile_context>
chip_gen: v6e
topology: v6e:2x2x1
jax: 0.10.0
libtpu: 0.0.40
codegen_flags: <defaults>
</compile_context>

<pallas_src>
import numpy as np
import jax
import jax.numpy as jnp
from jax.experimental import pallas as pl
from jax.experimental.pallas import tpu as pltpu


def _identity_flow_dma_kernel(x_hbm, out_hbm, sem):
    # Identity base flow: y = x, implemented as one HBM->HBM DMA.
    cp = pltpu.make_async_copy(x_hbm, out_hbm, sem)
    cp.start()
    cp.wait()


def _identity_flow_copy(x_flat: jnp.ndarray) -> jnp.ndarray:
    B, D = x_flat.shape
    itemsize = jnp.dtype(x_flat.dtype).itemsize
    return pl.pallas_call(
        _identity_flow_dma_kernel,
        out_shape=jax.ShapeDtypeStruct((B, D), x_flat.dtype),
        in_specs=[pl.BlockSpec(memory_space=pl.ANY)],
        out_specs=pl.BlockSpec(memory_space=pl.ANY),
        scratch_shapes=[pltpu.SemaphoreType.DMA(())],
        cost_estimate=pl.CostEstimate(
            flops=0,
            transcendentals=0,
            bytes_accessed=2 * B * D * itemsize,
        ),
    )(x_flat)


class BaseNFConfig:
    def __init__(self, input_dim):
        if input_dim is None:
            raise AttributeError(
                "No input dimension provided! 'input_dim' must be set to the "
                "data shape (C, H, W, ...)."
            )
        self.input_dim = tuple(input_dim)


class BaseNF:
    """JAX/Pallas port of the BaseNF base class (identity base flow)."""

    def __init__(self, model_config: BaseNFConfig):
        if model_config.input_dim is None:
            raise AttributeError(
                "No input dimension provided! 'input_dim' parameter must be set."
            )
        self.model_config = model_config
        self.input_dim = int(np.prod(model_config.input_dim))
        # NOTE: BaseNF defines no parameters in __init__, so there are no
        # weights to initialize.

    def forward(self, x: jnp.ndarray):
        B = x.shape[0]
        D = self.input_dim
        assert int(np.prod(x.shape[1:])) == D, (
            f"expected prod(x.shape[1:]) == {D}, got {x.shape}"
        )

        # Glue: flatten NCHW -> (B, D).  Metadata-only under jit; the identity
        # flow itself is a single HBM->HBM DMA inside the Pallas kernel.
        x_flat = x.reshape(B, D)
        out = _identity_flow_copy(x_flat)

        # Per-sample log|det Jacobian| of the identity map is exactly 0.
        # Computed in the wrapper (free) instead of in the kernel.
        log_abs_det_jac = jnp.zeros((B,), jnp.float32)

        return {"out": out, "log_abs_det_jac": log_abs_det_jac}

    def inverse(self, y: jnp.ndarray):
        # Identity base flow: inverse is the same map.
        return self.forward(y)

    def update(self):
        pass


if __name__ == "__main__":
    key = jax.random.PRNGKey(0)

    # Small shapes consistent with the module's (C, H, W) data contract.
    B, C, H, W = 2, 4, 16, 16
    x = jax.random.normal(key, (B, C, H, W), dtype=jnp.float32)

    model = BaseNF(BaseNFConfig(input_dim=(C, H, W)))
    result = model.forward(x)
    out = jax.block_until_ready(result["out"])
    logdet = jax.block_until_ready(result["log_abs_det_jac"])

    assert out.shape == (B, C * H * W)
    assert logdet.shape == (B,)
    np.testing.assert_allclose(np.asarray(out), np.asarray(x).reshape(B, -1))
    np.testing.assert_allclose(np.asarray(logdet), np.zeros(B, np.float32))

    # Second case: D not a multiple of 128 (3*17*17 = 867) — the raw-HBM DMA
    # path is layout/divisibility agnostic, so no special handling is needed.
    B2, C2, H2, W2 = 16, 3, 17, 17
    x2 = jax.random.normal(jax.random.PRNGKey(0), (B2, C2, H2, W2), jnp.float32)
    model2 = BaseNF(BaseNFConfig(input_dim=(C2, H2, W2)))
    result2 = model2.forward(x2)
    out2 = jax.block_until_ready(result2["out"])
    logdet2 = jax.block_until_ready(result2["log_abs_det_jac"])

    assert out2.shape == (B2, C2 * H2 * W2)
    np.testing.assert_allclose(np.asarray(out2), np.asarray(x2).reshape(B2, -1))
    np.testing.assert_allclose(np.asarray(logdet2), np.zeros(B2, np.float32))

    # inverse() of the identity base flow maps back identically.
    inv = model.inverse(x)
    out_inv = jax.block_until_ready(inv["out"])
    np.testing.assert_allclose(np.asarray(out_inv), np.asarray(x).reshape(B, -1))

    print("KERNEL_OK")
</pallas_src>

<mosaic_0001>
module attributes {stable_mosaic.version = 11 : i64} {
  func.func @_identity_flow_dma_kernel(%arg0: memref<2x1024xf32, #tpu.memory_space<any>>, %arg1: memref<2x1024xf32, #tpu.memory_space<any>>, %arg2: memref<!tpu.dma_semaphore, #tpu.memory_space<semaphore_mem>>) attributes {dimension_semantics = [], scalar_prefetch = 0 : i64, scratch_operands = 1 : i64, tpu.core_type = #tpu.core_type<tc>} {
    tpu.enqueue_dma source(%arg0 : memref<2x1024xf32, #tpu.memory_space<any>>) target(%arg1 : memref<2x1024xf32, #tpu.memory_space<any>>) target_semaphore(%arg2 : memref<!tpu.dma_semaphore, #tpu.memory_space<semaphore_mem>>)
    tpu.wait_dma2 semaphore(%arg2 : memref<!tpu.dma_semaphore, #tpu.memory_space<semaphore_mem>>) src(%arg0 : memref<2x1024xf32, #tpu.memory_space<any>>) dst(%arg1 : memref<2x1024xf32, #tpu.memory_space<any>>)
    return
  }
}

</mosaic_0001>

<bundles_post_ra>
// kernel: tpu_custom_call.1
= control target key start
LH: loop header
LB: loop body
LE: loop exit
PB: predicated region body
PF: predicated region fallthrough
CT: control target
= control target key end

     0   :  { %s29_s6 = smov [#allocation2]   ;;  %s30_s7 = smov 131072   ;;  %s48_s0 = inlined_call_operand.hbm [shape: f32[2,1024], index: 0, kind: input, shape index: {}]   ;;  %s49_s1 = inlined_call_operand.hbm [shape: f32[2,1024], index: 1, kind: output, shape index: {}]  }
   0x1   :  { %s31_s8 = smov 0  }
   0x2   :  { %12 = dma.general %s48_s0, 256, %s49_s1, %s29_s6, %s30_s7, [#allocation4], %s31_s8, 0  }
   0x3   :  { %27 = dma.done.wait [#allocation2], 256 }
   0x4   :  { %28 = vsyncadd [#allocation2], 4294967040 }
   0x5   :  { %17 = vsyncmov [#allocation2] }
   0x8   :  { %s18_s13 = vpop.sfrf %17 }
   0x9   :  { %p23_p0 = scmp.ne.s32.totalorder %s18_s13, 0 }
   0xb   :  { %22 = shalt.err (%p23_p0)  }

</bundles_post_ra>
